<compile_context>
chip_gen: v7x
topology: tpu7x:2x2x1
jax: 0.10.0
libtpu: 0.0.40
codegen_flags: <defaults>
</compile_context>

<pallas_src>
import functools

import jax
import jax.numpy as jnp
from jax.experimental import pallas as pl
from jax.experimental.pallas import tpu as pltpu


# ---------------------------------------------------------------------------
# Packed-buffer layout (shared between the packer and the kernel)
# ---------------------------------------------------------------------------

def _ru8(n):
    return (n + 7) // 8 * 8


def _spack_offsets(num_metapaths, num_classes):
    """Row offsets of each section inside the packed small-weights buffer.

    Sections start on 8-row (sublane-tile) boundaries so every in-kernel slice is
    tile-aligned.  Layout (rows x H lanes):
      [0 : M)            be      (encoder biases, last layer)
      [wa : wa+1)        wa      (metapath-attention weight, nn.Linear(H,1).weight)
      [wct : wct+C)      Wc^T    (classifier weight in [out, in] layout)
      [bc : bc+C) lane 0 bc      (classifier bias, stored as a column)
      [ba : ba+1) lane 0 ba      (metapath-attention bias, last layer)
    """
    wa = _ru8(num_metapaths)
    wct = wa + 8
    bc = wct + _ru8(num_classes)
    ba = bc + _ru8(num_classes)
    total = ba + 8
    return wa, wct, bc, ba, total


# ---------------------------------------------------------------------------
# Fused Pallas kernel: last MAGNN layer + classifier, all in VMEM, no grid
# ---------------------------------------------------------------------------

def magnn_fused_kernel(inst_ref, we_ref, sp_ref, o_ref):
    """Fused MAGNN forward (live path only).

    inst: [M, H]     per-metapath instance vectors (tensor branch of MAGNNLayer)
    we:   [M, H, H]  last layer's per-metapath encoder weights, PyTorch [out, in] layout
    sp:   [S, H]     packed small weights (see _spack_offsets)
    out:  [C, 1]     classifier logits (column; wrapper squeezes the lane dim)
    """
    M, _ = inst_ref.shape
    C = o_ref.shape[0]
    off_wa, off_wct, off_bc, off_ba, _ = _spack_offsets(M, C)

    inst = inst_ref[...]                                       # [M, H]
    we = we_ref[...]                                           # [M, H, H]

    be = sp_ref[0:M, :]                                        # [M, H]
    wa = sp_ref[off_wa:off_wa + 1, :]                          # [1, H]
    wcT = sp_ref[off_wct:off_wct + C, :]                       # [C, H]
    bc = sp_ref[off_bc:off_bc + C, 0:1]                        # [C, 1]
    ba = sp_ref[off_ba:off_ba + 1, 0:1]                        # [1, 1]

    # Per-metapath Linear encoders: contraction over the lane (last) axis — VPU multiply
    # + lane reduce; at M=6, H=32 this beats feeding the MXU with 1x32 mat-vecs.
    enc = jnp.sum(inst[:, None, :] * we, axis=-1) + be         # [M, H]

    # Metapath attention: Linear(H,1) -> LeakyReLU(0.2) -> softmax over metapaths.
    scores = jnp.sum(enc * wa, axis=-1, keepdims=True) + ba    # [M, 1]
    scores = jnp.where(scores > 0, scores, 0.2 * scores)       # LeakyReLU(0.2)
    mmax = jnp.max(scores, axis=0, keepdims=True)
    e = jnp.exp(scores - mmax)
    attn = e / jnp.sum(e, axis=0, keepdims=True)               # softmax over metapaths

    o = jnp.sum(attn * enc, axis=0, keepdims=True)             # [1, H]
    # ELU(alpha=1); exp only sees non-positive values (the positive branch is masked).
    out = jnp.where(o > 0, o, jnp.exp(jnp.minimum(o, 0.0)) - 1.0)
    # TODO(synk): nn.Dropout(0.5) is identity in eval mode; training-mode masking is not
    # reproduced.

    # Classifier on the VPU (no MXU): [C,H] * [1,H] broadcast, lane reduce -> [C,1].
    o_ref[...] = jnp.sum(wcT * out, axis=-1, keepdims=True) + bc


_VMEM = pl.BlockSpec(memory_space=pltpu.MemorySpace.VMEM)


@functools.partial(jax.jit, static_argnames=("num_classes",))
def _forward_core(inst, we_last, spack, *, num_classes):
    logits_col = pl.pallas_call(
        magnn_fused_kernel,
        out_shape=jax.ShapeDtypeStruct((num_classes, 1), jnp.float32),
        in_specs=[_VMEM, _VMEM, _VMEM],
        out_specs=_VMEM,
    )(inst, we_last, spack)
    return logits_col[:, 0]


# ---------------------------------------------------------------------------
# Parameters
# ---------------------------------------------------------------------------

def init_params(key, node_dims, hidden, num_classes, num_layers, num_metapaths):
    assert num_layers >= 1, "num_layers must be >= 1 (classifier consumes a layer output)"

    def nrm(k, shape, scale=0.1):
        return scale * jax.random.normal(k, shape, dtype=jnp.float32)

    keys = iter(jax.random.split(key, 64))
    params = {"feat_transform": {}}
    # Per-node-type feature transforms exist in the module, but their outputs are never
    # consumed by the tensor-branch layers -> dead code.  Kept only for parameter parity.
    for t, d in node_dims.items():
        params["feat_transform"][t] = (nrm(next(keys), (d, hidden)),
                                       nrm(next(keys), (hidden,)))
    # Stacked MAGNN-layer parameters ([out, in] encoder layout for lane contraction).
    params["We"] = nrm(next(keys), (num_layers, num_metapaths, hidden, hidden))
    params["be"] = nrm(next(keys), (num_layers, num_metapaths, hidden))
    params["wa"] = nrm(next(keys), (num_layers, 1, hidden))
    params["ba"] = nrm(next(keys), (num_layers,))
    # NOTE: the per-edge-type attention heads Linear(2*hidden, 1) are only used in the
    # unreachable (node_type, node_id) list branch; intentionally not materialized.
    params["Wc"] = nrm(next(keys), (hidden, num_classes))
    params["bc"] = nrm(next(keys), (1, num_classes))

    # ---- one-time packing of the LIVE (last-layer) weights for the kernel ----
    off_wa, off_wct, off_bc, off_ba, total = _spack_offsets(num_metapaths, num_classes)
    spack = jnp.zeros((total, hidden), dtype=jnp.float32)
    spack = spack.at[0:num_metapaths, :].set(params["be"][-1])
    spack = spack.at[off_wa, :].set(params["wa"][-1, 0])
    spack = spack.at[off_wct:off_wct + num_classes, :].set(params["Wc"].T)
    spack = spack.at[off_bc:off_bc + num_classes, 0].set(params["bc"][0])
    spack = spack.at[off_ba, 0].set(params["ba"][-1])
    params["spack"] = spack
    params["We_last"] = params["We"][-1]          # [M, H, H], only layer that is live
    return params


# ---------------------------------------------------------------------------
# Model wrapper
# ---------------------------------------------------------------------------

def magnn_forward(params, state, x, edge_index):
    # `x` / `edge_index` are accepted for signature parity; the reference forward never
    # consumes them on the live path (edge_index only feeds the unreachable list branch).
    del x, edge_index
    return _forward_core(state["metapath_instances"],
                         params["We_last"], params["spack"],
                         num_classes=params["Wc"].shape[1])


def ref_forward(params, state):
    """Pure-JAX reference of the same forward pass (all layers), for verification."""
    inst = state["metapath_instances"]
    out = None
    for l in range(params["We"].shape[0]):
        enc = jnp.einsum("mh,mkh->mk", inst, params["We"][l]) + params["be"][l]
        scores = enc @ params["wa"][l, 0] + params["ba"][l]
        scores = jnp.where(scores > 0, scores, 0.2 * scores)
        attn = jax.nn.softmax(scores, axis=0)
        o = jnp.sum(attn[:, None] * enc, axis=0)
        out = jnp.where(o > 0, o, jnp.exp(o) - 1.0)
    return out @ params["Wc"] + params["bc"][0]


# ---------------------------------------------------------------------------
# Main
# ---------------------------------------------------------------------------

if __name__ == "__main__":
    hidden_dim = 32
    num_classes = 4
    num_layers = 2
    num_metapaths = 6

    node_dims = {"typeA": 12, "typeB": 16}
    num_nodes = {"typeA": 8, "typeB": 10}

    root = jax.random.PRNGKey(0)
    k_feat, k_inst, k_x, k_params = jax.random.split(root, 4)

    fa, fb = jax.random.split(k_feat)
    state = {
        "node_types": ["typeA", "typeB"],
        # Present for parity with the module; dead on the live forward path.
        "node_features": {
            "typeA": jax.random.normal(fa, (num_nodes["typeA"], node_dims["typeA"]),
                                       dtype=jnp.float32),
            "typeB": jax.random.normal(fb, (num_nodes["typeB"], node_dims["typeB"]),
                                       dtype=jnp.float32),
        },
        # Synthetic per-metapath instance tensors (the module itself leaves this empty,
        # which would crash its literal forward).
        "metapath_instances": jax.random.normal(k_inst, (num_metapaths, hidden_dim),
                                                dtype=jnp.float32),
    }

    params = init_params(k_params, node_dims, hidden_dim, num_classes,
                         num_layers, num_metapaths)

    # Unused-by-forward inputs, built for API parity.
    total_nodes = sum(num_nodes.values())
    x_in = jax.random.normal(k_x, (total_nodes, hidden_dim), dtype=jnp.float32)
    edge_index = jnp.zeros((2, 20), dtype=jnp.int32)

    logits = jax.block_until_ready(magnn_forward(params, state, x_in, edge_index))
    ref = jax.block_until_ready(ref_forward(params, state))

    assert logits.shape == (num_classes,), logits.shape
    assert jnp.allclose(logits, ref, atol=1e-3, rtol=1e-3), (logits, ref)
    print("KERNEL_OK")
</pallas_src>

<mosaic_0001>
module attributes {stable_mosaic.version = 11 : i64} {
  func.func @magnn_fused_kernel(%arg0: memref<6x32xf32, #tpu.memory_space<vmem>>, %arg1: memref<6x32x32xf32, #tpu.memory_space<vmem>>, %arg2: memref<40x32xf32, #tpu.memory_space<vmem>>, %arg3: memref<4x1xf32, #tpu.memory_space<vmem>>) attributes {dimension_semantics = [], scalar_prefetch = 0 : i64, scratch_operands = 0 : i64, tpu.core_type = #tpu.core_type<tc>} {
    %c0 = arith.constant 0 : index
    %c0_0 = arith.constant 0 : index
    %0 = vector.load %arg0[%c0, %c0_0] : memref<6x32xf32, #tpu.memory_space<vmem>>, vector<6x32xf32>
    %c0_1 = arith.constant 0 : index
    %c0_2 = arith.constant 0 : index
    %c0_3 = arith.constant 0 : index
    %1 = vector.load %arg1[%c0_1, %c0_2, %c0_3] : memref<6x32x32xf32, #tpu.memory_space<vmem>>, vector<6x32x32xf32>
    %c0_4 = arith.constant 0 : index
    %c0_5 = arith.constant 0 : index
    %2 = vector.load %arg2[%c0_4, %c0_5] : memref<40x32xf32, #tpu.memory_space<vmem>>, vector<6x32xf32>
    %c8 = arith.constant 8 : index
    %c0_6 = arith.constant 0 : index
    %3 = vector.load %arg2[%c8, %c0_6] : memref<40x32xf32, #tpu.memory_space<vmem>>, vector<1x32xf32>
    %c16 = arith.constant 16 : index
    %c0_7 = arith.constant 0 : index
    %4 = vector.load %arg2[%c16, %c0_7] : memref<40x32xf32, #tpu.memory_space<vmem>>, vector<4x32xf32>
    %c24 = arith.constant 24 : index
    %c0_8 = arith.constant 0 : index
    %5 = vector.load %arg2[%c24, %c0_8] : memref<40x32xf32, #tpu.memory_space<vmem>>, vector<4x1xf32>
    %c32 = arith.constant 32 : index
    %c0_9 = arith.constant 0 : index
    %6 = vector.load %arg2[%c32, %c0_9] : memref<40x32xf32, #tpu.memory_space<vmem>>, vector<1x1xf32>
    %7 = vector.shape_cast %0 : vector<6x32xf32> to vector<6x1x32xf32>
    %8 = vector.broadcast %7 : vector<6x1x32xf32> to vector<6x32x32xf32>
    %9 = arith.mulf %8, %1 : vector<6x32x32xf32>
    %cst = arith.constant dense<0.000000e+00> : vector<6x32xf32>
    %10 = vector.multi_reduction <add>, %9, %cst [2] : vector<6x32x32xf32> to vector<6x32xf32>
    %11 = arith.addf %10, %2 : vector<6x32xf32>
    %12 = vector.broadcast %3 : vector<1x32xf32> to vector<6x32xf32>
    %13 = arith.mulf %11, %12 : vector<6x32xf32>
    %cst_10 = arith.constant dense<0.000000e+00> : vector<6xf32>
    %14 = vector.multi_reduction <add>, %13, %cst_10 [1] : vector<6x32xf32> to vector<6xf32>
    %15 = vector.shape_cast %14 : vector<6xf32> to vector<6x1xf32>
    %16 = vector.broadcast %6 : vector<1x1xf32> to vector<6x1xf32>
    %17 = arith.addf %15, %16 : vector<6x1xf32>
    %cst_11 = arith.constant 0.000000e+00 : f32
    %18 = vector.broadcast %cst_11 : f32 to vector<6x1xf32>
    %19 = arith.cmpf ogt, %17, %18 : vector<6x1xf32>
    %cst_12 = arith.constant 2.000000e-01 : f32
    %20 = vector.broadcast %cst_12 : f32 to vector<6x1xf32>
    %21 = arith.mulf %20, %17 : vector<6x1xf32>
    %22 = arith.select %19, %17, %21 : vector<6x1xi1>, vector<6x1xf32>
    %cst_13 = arith.constant dense<0xFF800000> : vector<1xf32>
    %23 = vector.multi_reduction <maximumf>, %22, %cst_13 [0] : vector<6x1xf32> to vector<1xf32>
    %24 = vector.shape_cast %23 : vector<1xf32> to vector<1x1xf32>
    %25 = vector.broadcast %24 : vector<1x1xf32> to vector<6x1xf32>
    %26 = arith.subf %22, %25 : vector<6x1xf32>
    %27 = math.exp %26 : vector<6x1xf32>
    %cst_14 = arith.constant dense<0.000000e+00> : vector<1xf32>
    %28 = vector.multi_reduction <add>, %27, %cst_14 [0] : vector<6x1xf32> to vector<1xf32>
    %29 = vector.shape_cast %28 : vector<1xf32> to vector<1x1xf32>
    %30 = vector.broadcast %29 : vector<1x1xf32> to vector<6x1xf32>
    %31 = arith.divf %27, %30 : vector<6x1xf32>
    %32 = vector.broadcast %31 : vector<6x1xf32> to vector<6x32xf32>
    %33 = arith.mulf %32, %11 : vector<6x32xf32>
    %cst_15 = arith.constant dense<0.000000e+00> : vector<32xf32>
    %34 = vector.multi_reduction <add>, %33, %cst_15 [0] : vector<6x32xf32> to vector<32xf32>
    %35 = vector.shape_cast %34 : vector<32xf32> to vector<1x32xf32>
    %cst_16 = arith.constant 0.000000e+00 : f32
    %36 = vector.broadcast %cst_16 : f32 to vector<1x32xf32>
    %37 = arith.cmpf ogt, %35, %36 : vector<1x32xf32>
    %cst_17 = arith.constant 0.000000e+00 : f32
    %38 = vector.broadcast %cst_17 : f32 to vector<1x32xf32>
    %39 = arith.minimumf %35, %38 : vector<1x32xf32>
    %40 = math.exp %39 : vector<1x32xf32>
    %cst_18 = arith.constant 1.000000e+00 : f32
    %41 = vector.broadcast %cst_18 : f32 to vector<1x32xf32>
    %42 = arith.subf %40, %41 : vector<1x32xf32>
    %43 = arith.select %37, %35, %42 : vector<1x32xi1>, vector<1x32xf32>
    %44 = vector.broadcast %43 : vector<1x32xf32> to vector<4x32xf32>
    %45 = arith.mulf %4, %44 : vector<4x32xf32>
    %cst_19 = arith.constant dense<0.000000e+00> : vector<4xf32>
    %46 = vector.multi_reduction <add>, %45, %cst_19 [1] : vector<4x32xf32> to vector<4xf32>
    %47 = vector.shape_cast %46 : vector<4xf32> to vector<4x1xf32>
    %48 = arith.addf %47, %5 : vector<4x1xf32>
    %c0_20 = arith.constant 0 : index
    %c0_21 = arith.constant 0 : index
    %49 = vector.load %arg3[%c0_20, %c0_21] : memref<4x1xf32, #tpu.memory_space<vmem>>, vector<4x1xf32>
    tpu.vector_store %arg3[%c0_20, %c0_21], %48 {strides = array<i32>} : memref<4x1xf32, #tpu.memory_space<vmem>>, vector<4x1xf32>,
    return
  }
}

</mosaic_0001>

<bundles_post_ra>
// kernel: _forward_core.1
= control target key start
LH: loop header
LB: loop body
LE: loop exit
PB: predicated region body
PF: predicated region fallthrough
CT: control target
= control target key end

     0   :  { %8 = vsyncpa [#allocation3], 0  ;;  %s994_s12 = smov [#allocation2]   ;;  %s1342_s0 = inlined_call_operand.vmem [shape: f32[6,32], index: 0, kind: input, shape index: {}]   ;;  %s1343_s1 = inlined_call_operand.hbm [shape: f32[6,32,32], index: 1, kind: input, shape index: {}]   ;;  %s1344_s2 = inlined_call_operand.vmem [shape: f32[40,32], index: 2, kind: input, shape index: {}]   ;;  %s1345_s3 = inlined_call_operand.vmem [shape: f32[4,1], index: 3, kind: output, shape index: {}]  }
   0x1   :  { %s16_s13 = sshll.u32 %s994_s12, 4  ;;  %s970_s16 = scalar_lea.hbm %s1343_s1, 3072  ;;  %s17_s13 = int_to_ptr.vmem [resolvable:$true] %s16_s13 }
   0x2   :  { %p971_p0 = scmp.ne.s32.totalorder %s1343_s1, %s970_s16  ;;  %p974_p1 = scmp.lt.u32.totalorder %s970_s16, %s1343_s1 }
   0x4   :  { %p976_p2 = pnand %p974_p1, %p971_p0 }
   0x6   :  { %979 = shalt.err (!%p976_p2)
}
   0x7   :  { %s980_s21 = scalar_lea.vmem %s17_s13, 3072  ;;  %p985_p4 = scmp.lt.s32.totalorder %s17_s13, %s17_s13 }
   0x8   :  { %p981_p3 = scmp.ne.s32.totalorder %s17_s13, %s980_s21  ;;  %p986_p5 = scmp.lt.s32.totalorder %s980_s21, %s980_s21 }
   0xa   :  { %p987_p6 = por %p986_p5, %p985_p4 }
   0xc   :  { %p988_p7 = pnand %p987_p6, %p981_p3 }
   0xe   :  { %991 = shalt.err (!%p988_p7)
}
   0xf   :  { %s995_s22 = smov 128   ;;  %s996_s23 = smov 8  }
  0x10   :  { %22 = dma.hbm_to_vmem [thread:$0]  %s1343_s1, 3072, %s17_s13, [#allocation3], %s995_s22, %s995_s22, %s996_s23  }
  0x11   :  { %992 = dma.done.wait [#allocation3], 3072  }
  0x12   :  { %993 = vsyncadd [#allocation3], 4294964224  ;;  %v63_v0 = vlaneseq  ;;  %v997_v1 = vmov 1966171168   ;;  %v28_v6 = vld [vmem:[%s1342_s0] sm:$0x3f] }
  0x13   :  { %v61_v2 = vunpack.c.l.s4 %v997_v1  ;;  %v29_v11 = vld [vmem:[#allocation2] sm:$0xff]  ;;  %v30_v12 = vld [vmem:[#allocation2 + $0x8] sm:$0xff]  ;;  %vm160_vm0 = vcmask 261120   ;;  %v31_v20 = vld [vmem:[#allocation2 + $0x10] sm:$0xff]  ;;  %v59_v37 = vcombine.high %v28_v6, %v28_v6  ;;  %vm551_vm1 = vcmask 130112  }
  0x14   :  { %v1032_v3 = vshrl.u32 %v63_v0, 7  ;;  %v33_v15 = vld [vmem:[#allocation2 + $0x20] sm:$0xff]  ;;  %v34_v16 = vld [vmem:[#allocation2 + $0x28] sm:$0xff]  ;;  %v35_v25 = vld [vmem:[#allocation2 + $0x30] sm:$0xff]  ;;  %vm558_vm2 = vcmask 195712   ;;  %vm565_vm3 = vcmask 261312  }
  0x15   :  { %v62_v4 = vunpack.c.0.s8 %v61_v2  ;;  %v32_v29 = vld [vmem:[#allocation2 + $0x18] sm:$0xff]  ;;  %v38_v33 = vld [vmem:[#allocation2 + $0x48] sm:$0xff]  ;;  %v37_v36 = vld [vmem:[#allocation2 + $0x40] sm:$0xff]  ;;  %vm662_vm4 = vcmask 1041409   ;;  %vm664_vm5 = vcmask 1042434   ;;  %vm666_vm6 = vcmask 1043459  }
  0x16   :  { %v1042_v8 = vsub.s32 0, %v1032_v3  ;;  %v36_v41 = vld [vmem:[#allocation2 + $0x38] sm:$0xff]  ;;  %v39_v44 = vld [vmem:[#allocation2 + $0x50] sm:$0xff]  ;;  %v41_v49 = vld [vmem:[#allocation2 + $0x60] sm:$0xff]  ;;  %vm668_vm7 = vcmask 1044484   ;;  %vm670_vm8 = vcmask 1045509  }
  0x17   :  { %v1035_v5 = vsub.s32 %v62_v4, %v1032_v3  ;;  %v42_v52 = vld [vmem:[#allocation2 + $0x68] sm:$0xff]  ;;  %v40_v56 = vld [vmem:[#allocation2 + $0x58] sm:$0xff]  ;;  %v43_v59 = vld [vmem:[#allocation2 + $0x70] sm:$0xff]  ;;  %vm673_vm9 = vcmask 259072   ;;  %vm685_vm10 = vcmask 5120   ;;  %vm941_vm13 = vcmask 257024  }
  0x18   :  { %v45_v1 = vld [vmem:[#allocation2 + $0x80] sm:$0xff]  ;;  %vm946_vm14 = vcmask 3072  }
  0x19   :  { %v66_v7 = vrot.slane %v28_v6, %v1035_v5  ;;  %v73_v48 = vrot.slane %v59_v37, %v1035_v5  ;;  %v46_v6 = vld [vmem:[#allocation2 + $0x88] sm:$0xff]  ;;  %v255_v37 = vsub.s32 1, %v1032_v3 }
  0x1b   :  { %v82_v9 = vrot.slane %v66_v7, %v1035_v5  ;;  %v74_v10 = vcombine.high %v66_v7, %v66_v7  ;;  %v89_v55 = vrot.slane %v73_v48, %v1035_v5  ;;  %v75_v63 = vcombine.high %v73_v48, %v73_v48 }
  0x1d   :  { %v109_v13 = vrot.slane %v82_v9, %v1042_v8  ;;  %v96_v14 = vrot.slane %v74_v10, %v1035_v5  ;;  %v104_v24 = vcombine.high %v82_v9, %v82_v9  ;;  %v125_v62 = vrot.slane %v89_v55, %v1042_v8 }
  0x1e   :  { %v103_v10 = vrot.slane %v75_v63, %v1035_v5 }
  0x1f   :  { %v136_v17 = vmul.f32 %v109_v13, %v29_v11  ;;  %v113_v18 = vrot.slane %v96_v14, %v1042_v8  ;;  %v137_v19 = vmul.f32 %v109_v13, %v30_v12  ;;  %v138_v28 = vmul.f32 %v109_v13, %v31_v20  ;;  %v44_v11 = vld [vmem:[#allocation2 + $0x78] sm:$0xff] }
  0x20   :  { %v117_v32 = vrot.slane %v104_v24, %v1042_v8  ;;  %v139_v35 = vmul.f32 %v109_v13, %v32_v29  ;;  %v105_v40 = vcombine.high %v96_v14, %v96_v14  ;;  %v152_v9 = vmul.f32 %v125_v62, %v45_v1  ;;  %v47_v14 = vld [vmem:[#allocation2 + $0x90] sm:$0xff]  ;;  %v52_v29 = vld [vmem:[#allocation2 + $0xb8] sm:$0xff] }
  0x21   :  { %v161_v21 = vsel %vm160_vm0, %v136_v17, 0.0  ;;  %v140_v22 = vmul.f32 %v113_v18, %v33_v15  ;;  %v141_v23 = vmul.f32 %v113_v18, %v34_v16  ;;  %v164_v27 = vsel %vm160_vm0, %v137_v19, 0.0 }
  0x22   :  { %162 = vadd.xlane.f32.xlu0 %v161_v21  ;;  %v142_v31 = vmul.f32 %v113_v18, %v35_v25  ;;  %v167_v34 = vsel %vm160_vm0, %v138_v28, 0.0  ;;  %v145_v39 = vmul.f32 %v117_v32, %v38_v33  ;;  %v170_v42 = vsel %vm160_vm0, %v139_v35, 0.0  ;;  %v50_v21 = vld [vmem:[#allocation2 + $0xa8] sm:$0xff] }
  0x23   :  { %v173_v26 = vsel %vm160_vm0, %v140_v22, 0.0  ;;  %v176_v30 = vsel %vm160_vm0, %v141_v23, 0.0  ;;  %v144_v43 = vmul.f32 %v117_v32, %v37_v36  ;;  %v143_v46 = vmul.f32 %v113_v18, %v36_v41  ;;  %v49_v18 = vld [vmem:[#allocation2 + $0xa0] sm:$0xff]  ;;  %v48_v23 = vld [vmem:[#allocation2 + $0x98] sm:$0xff] }
  0x24   :  { %174 = vadd.xlane.f32.xlu1 %v173_v26  ;;  %v179_v38 = vsel %vm160_vm0, %v142_v31, 0.0  ;;  %v188_v45 = vsel %vm160_vm0, %v145_v39, 0.0  ;;  %v121_v47 = vrot.slane %v105_v40, %v1042_v8  ;;  %v146_v51 = vmul.f32 %v117_v32, %v39_v44  ;;  %v51_v26 = vld [vmem:[#allocation2 + $0xb0] sm:$0xff]  ;;  %v53_v36 = vld [vmem:[%s1344_s2] sm:$0x3f] }
  0x25   :  { %v185_v50 = vsel %vm160_vm0, %v144_v43, 0.0  ;;  %v182_v53 = vsel %vm160_vm0, %v143_v46, 0.0  ;;  %v147_v61 = vmul.f32 %v117_v32, %v40_v56  ;;  %v153_v13 = vmul.f32 %v125_v62, %v46_v6  ;;  %v953_v44 = vld [vmem:[%s1344_s2 + $0x8] ss:$0 sm:$0xff] }
  0x26   :  { %165 = vadd.xlane.f32.xlu0 %v164_v27  ;;  %v148_v54 = vmul.f32 %v121_v47, %v41_v49  ;;  %v191_v57 = vsel %vm160_vm0, %v146_v51, 0.0  ;;  %v149_v58 = vmul.f32 %v121_v47, %v42_v52  ;;  %v150_v4 = vmul.f32 %v121_v47, %v43_v59 }
  0x27   :  { %v194_v7 = vsel %vm160_vm0, %v147_v61, 0.0  ;;  %v209_v15 = vsel %vm160_vm0, %v152_v9, 0.0  ;;  %v151_v16 = vmul.f32 %v121_v47, %v44_v11  ;;  %v129_v17 = vrot.slane %v103_v10, %v1042_v8 }
  0x28   :  { %177 = vadd.xlane.f32.xlu1 %v176_v30  ;;  %v197_v60 = vsel %vm160_vm0, %v148_v54, 0.0  ;;  %v200_v2 = vsel %vm160_vm0, %v149_v58, 0.0  ;;  %v203_v12 = vsel %vm160_vm0, %v150_v4, 0.0  ;;  %v212_v19 = vsel %vm160_vm0, %v153_v13, 0.0 }
  0x29   :  { %v154_v20 = vmul.f32 %v125_v62, %v47_v14  ;;  %v206_v5 = vsel %vm160_vm0, %v151_v16, 0.0  ;;  %v156_v22 = vmul.f32 %v129_v17, %v49_v18  ;;  %v157_v25 = vmul.f32 %v129_v17, %v50_v21 }
  0x2a   :  { %168 = vadd.xlane.f32.xlu0 %v167_v34  ;;  %v155_v28 = vmul.f32 %v125_v62, %v48_v23  ;;  %v158_v31 = vmul.f32 %v129_v17, %v51_v26  ;;  %v159_v33 = vmul.f32 %v129_v17, %v52_v29  ;;  %v256_v39 = vrot.slane %v53_v36, %v255_v37 }
  0x2b   :  { %v215_v24 = vsel %vm160_vm0, %v154_v20, 0.0  ;;  %v221_v27 = vsel %vm160_vm0, %v156_v22, 0.0  ;;  %v224_v30 = vsel %vm160_vm0, %v157_v25, 0.0  ;;  %v274_v40 = vsub.s32 2, %v1032_v3 }
  0x2c   :  { %180 = vadd.xlane.f32.xlu1 %v179_v38  ;;  %v218_v32 = vsel %vm160_vm0, %v155_v28, 0.0  ;;  %v227_v34 = vsel %vm160_vm0, %v158_v31, 0.0  ;;  %v230_v35 = vsel %vm160_vm0, %v159_v33, 0.0  ;;  %v237_v38 = vrot.slane %v53_v36, %v1042_v8 }
  0x2d   :  { %v275_v41 = vrot.slane %v53_v36, %v274_v40  ;;  %v998_v8 = vmov 0   ;;  %v331_v47 = vsub.s32 5, %v1032_v3 }
  0x2e   :  { %171 = vadd.xlane.f32.xlu0 %v170_v42  ;;  %v293_v42 = vsub.s32 3, %v1032_v3  ;;  %962 = vset.pattern.permute.xlu1 %v998_v8 }
  0x2f   :  { %961 = vset.pattern.permute.xlu0 %v998_v8  ;;  %v332_v48 = vrot.slane %v53_v36, %v331_v47 }
  0x30   :  { %189 = vadd.xlane.f32.xlu1 %v188_v45  ;;  %v294_v43 = vrot.slane %v53_v36, %v293_v42  ;;  %v312_v45 = vsub.s32 4, %v1032_v3 }
  0x32   :  { %186 = vadd.xlane.f32.xlu0 %v185_v50  ;;  %v313_v46 = vrot.slane %v53_v36, %v312_v45 }
  0x34   :  { %183 = vadd.xlane.f32.xlu1 %v182_v53 }
  0x36   :  { %192 = vadd.xlane.f32.xlu0 %v191_v57 }
  0x38   :  { %198 = vadd.xlane.f32.xlu1 %v197_v60 }
  0x3a   :  { %201 = vadd.xlane.f32.xlu0 %v200_v2 }
  0x3c   :  { %195 = vadd.xlane.f32.xlu1 %v194_v7 }
  0x3e   :  { %204 = vadd.xlane.f32.xlu0 %v203_v12 }
  0x40   :  { %210 = vadd.xlane.f32.xlu1 %v209_v15 }
  0x42   :  { %213 = vadd.xlane.f32.xlu0 %v212_v19 }
  0x44   :  { %207 = vadd.xlane.f32.xlu1 %v206_v5 }
  0x46   :  { %216 = vadd.xlane.f32.xlu0 %v215_v24 }
  0x48   :  { %222 = vadd.xlane.f32.xlu1 %v221_v27 }
  0x4a   :  { %225 = vadd.xlane.f32.xlu0 %v224_v30 }
  0x4c   :  { %219 = vadd.xlane.f32.xlu1 %v218_v32 }
  0x4e   :  { %228 = vadd.xlane.f32.xlu0 %v227_v34 }
  0x50   :  { %231 = vadd.xlane.f32.xlu1 %v230_v35 }
  0x61   :  { %243 = vbcast.lane.b32.xlu1 %v237_v38, 264 }
  0x64   :  { %239 = vbcast.lane.b32.xlu0 %v237_v38, 256 }
  0x65   :  { %258 = vbcast.lane.b32.xlu1 %v256_v39, 256 }
  0x68   :  { %247 = vbcast.lane.b32.xlu0 %v237_v38, 272 }
  0x69   :  { %262 = vbcast.lane.b32.xlu1 %v256_v39, 264 }
  0x6c   :  { %277 = vbcast.lane.b32.xlu0 %v275_v41, 256 }
  0x6d   :  { %266 = vbcast.lane.b32.xlu1 %v256_v39, 272 }
  0x70   :  { %251 = vbcast.lane.b32.xlu0 %v237_v38, 280 }
  0x71   :  { %281 = vbcast.lane.b32.xlu1 %v275_v41, 264 }
  0x74   :  { %285 = vbcast.lane.b32.xlu0 %v275_v41, 272 }
  0x75   :  { %270 = vbcast.lane.b32.xlu1 %v256_v39, 280 }
  0x78   :  { %300 = vbcast.lane.b32.xlu0 %v294_v43, 264 }
  0x79   :  { %296 = vbcast.lane.b32.xlu1 %v294_v43, 256 }
  0x7c   :  { %406 = vbcast.lane.b32.xlu0 %v953_v44, 264 }
  0x7d   :  { %402 = vbcast.lane.b32.xlu1 %v953_v44, 256 }
  0x80   :  { %304 = vbcast.lane.b32.xlu0 %v294_v43, 272 }
  0x81   :  { %289 = vbcast.lane.b32.xlu1 %v275_v41, 280 }
  0x84   :  { %319 = vbcast.lane.b32.xlu0 %v313_v46, 264 }
  0x85   :  { %315 = vbcast.lane.b32.xlu1 %v313_v46, 256 }
  0x88   :  { %308 = vbcast.lane.b32.xlu0 %v294_v43, 280 }
  0x89   :  { %410 = vbcast.lane.b32.xlu1 %v953_v44, 272 }
  0x8c   :  { %334 = vbcast.lane.b32.xlu0 %v332_v48, 256 }
  0x8d   :  { %323 = vbcast.lane.b32.xlu1 %v313_v46, 272 }
  0x90   :  { %414 = vbcast.lane.b32.xlu0 %v953_v44, 280 }
  0x91   :  { %338 = vbcast.lane.b32.xlu1 %v332_v48, 264 }
  0x94   :  { %342 = vbcast.lane.b32.xlu0 %v332_v48, 272 }
  0x95   :  { %327 = vbcast.lane.b32.xlu1 %v313_v46, 280 }
  0x99   :  { %346 = vbcast.lane.b32.xlu1 %v332_v48, 280 }
  0xaf   :  { %v163_v49 = vpop.xlane.xlu0 %162 }
  0xb1   :  { %v1091_v50 = vpop.xlane.xlu1 %174 }
  0xb3   :  { %v166_v51 = vpop.xlane.xlu0 %165 }
  0xb5   :  { %v178_v52 = vpop.xlane.xlu1 %177 }
  0xb7   :  { %v169_v53 = vpop.xlane.xlu0 %168 }
  0xb9   :  { %v181_v54 = vpop.xlane.xlu1 %180 }
  0xbb   :  { %v172_v55 = vpop.xlane.xlu0 %171 }
  0xbd   :  { %v190_v56 = vpop.xlane.xlu1 %189 }
  0xbf   :  { %v1093_v57 = vpop.xlane.xlu0 %186 }
  0xc1   :  { %v184_v58 = vpop.xlane.xlu1 %183 }
  0xc3   :  { %v1095_v59 = vpop.xlane.xlu0 %192 }
  0xc5   :  { %v1097_v60 = vpop.xlane.xlu1 %198 }
  0xc7   :  { %v1099_v61 = vpop.xlane.xlu0 %201 }
  0xc9   :  { %v196_v62 = vpop.xlane.xlu1 %195 }
  0xcb   :  { %v1101_v63 = vpop.xlane.xlu0 %204 }
  0xcd   :  { %v1103_v1 = vpop.xlane.xlu1 %210 }
  0xcf   :  { %v1105_v2 = vpop.xlane.xlu0 %213 }
  0xd1   :  { %v1107_v4 = vpop.xlane.xlu1 %207 }
  0xd3   :  { %v1109_v6 = vpop.xlane.xlu0 %216 }
  0xd5   :  { %v1111_v7 = vpop.xlane.xlu1 %222 }
  0xd7   :  { %v1113_v9 = vpop.xlane.xlu0 %225 }
  0xd9   :  { %v1115_v10 = vpop.xlane.xlu1 %219 }
  0xdb   :  { %v1117_v11 = vpop.xlane.xlu0 %228 }
  0xdd   :  { %v1119_v12 = vpop.xlane.xlu1 %231 }
  0xdf   :  { %v240_v13 = vpop.permute.xlu0 %239 }
  0xe0   :  { %v1131_v29 = vadd.f32 %v240_v13, %v163_v49 }
  0xe1   :  { %v244_v14 = vpop.permute.xlu1 %243 }
  0xe2   :  { %v1123_v24 = vadd.f32 %v244_v14, %v166_v51 }
  0xe3   :  { %v248_v15 = vpop.permute.xlu0 %247 }
  0xe4   :  { %v1141_v39 = vadd.f32 %v248_v15, %v169_v53 }
  0xe5   :  { %v259_v16 = vpop.permute.xlu1 %258 }
  0xe6   :  { %v376_v49 = vadd.f32 %v259_v16, %v1091_v50 }
  0xe7   :  { %v278_v17 = vpop.permute.xlu0 %277 }
  0xe9   :  { %v263_v18 = vpop.permute.xlu1 %262 }
  0xea   :  { %v1137_v33 = vadd.f32 %v263_v18, %v178_v52 }
  0xeb   :  { %v252_v19 = vpop.permute.xlu0 %251 }
  0xec   :  { %v1151_v44 = vadd.f32 %v252_v19, %v172_v55  ;;  %v380_v55 = vadd.f32 %v278_v17, %v1093_v57 }
  0xed   :  { %v267_v20 = vpop.permute.xlu1 %266 }
  0xee   :  { %v1143_v40 = vadd.f32 %v267_v20, %v181_v54 }
  0xef   :  { %v286_v21 = vpop.permute.xlu0 %285 }
  0xf0   :  { %v382_v15 = vadd.f32 %v286_v21, %v1095_v59 }
  0xf1   :  { %v282_v5 = vpop.permute.xlu1 %281 }
  0xf2   :  { %v1153_v45 = vadd.f32 %v282_v5, %v190_v56 }
  0xf3   :  { %v1121_v22 = vpop.permute.xlu0 %300 }
  0xf5   :  { %v271_v23 = vpop.permute.xlu1 %270 }
  0xf6   :  { %v1159_v51 = vadd.f32 %v271_v23, %v184_v58 }
  0xf7   :  { %v1125_v25 = vpop.permute.xlu0 %406 }
  0xf8   :  { %v421_v26 = vmul.f32 %v1125_v25, %v1123_v24  ;;  %v425_v35 = vmul.f32 %v1125_v25, %v1137_v33  ;;  %v429_v47 = vmul.f32 %v1125_v25, %v1153_v45 }
  0xf9   :  { %v297_v27 = vpop.permute.xlu1 %296 }
  0xfa   :  { %472 = vperm.xlu1 %962, %v421_v26   ;;  %v384_v19 = vadd.f32 %v297_v27, %v1097_v60 }
  0xfb   :  { %v1129_v28 = vpop.permute.xlu0 %304 }
  0xfc   :  { %v386_v26 = vadd.f32 %v1129_v28, %v1101_v63 }
  0xfd   :  { %v1133_v30 = vpop.permute.xlu1 %402 }
  0xfe   :  { %v420_v31 = vmul.f32 %v1133_v30, %v1131_v29  ;;  %v424_v54 = vmul.f32 %v1133_v30, %v376_v49  ;;  %v428_v50 = vmul.f32 %v1133_v30, %v380_v55  ;;  %v432_v20 = vmul.f32 %v1133_v30, %v384_v19 }
  0xff   :  { %v320_v32 = vpop.permute.xlu0 %319 }
 0x100   :  { %469 = vperm.xlu0 %961, %v420_v31   ;;  %v389_v16 = vadd.f32 %v320_v32, %v1105_v2 }
 0x101   :  { %v290_v34 = vpop.permute.xlu1 %289 }
 0x102   :  { %v383_v56 = vadd.f32 %v290_v34, %v196_v62 }
 0x103   :  { %v309_v36 = vpop.permute.xlu0 %308 }
 0x104   :  { %484 = vperm.xlu0 %961, %v425_v35   ;;  %v1185_v21 = vadd.f32 %v309_v36, %v1107_v4 }
 0x105   :  { %v316_v37 = vpop.permute.xlu1 %315 }
 0x106   :  { %v1165_v13 = vadd.f32 %v316_v37, %v1103_v1  ;;  %v437_v1 = vmul.f32 %v1125_v25, %v389_v16 }
 0x107   :  { %v335_v38 = vpop.permute.xlu0 %334 }
 0x108   :  { %v436_v18 = vmul.f32 %v1133_v30, %v1165_v13 }
 0x109   :  { %v1145_v41 = vpop.permute.xlu1 %410 }
 0x10a   :  { %v426_v42 = vmul.f32 %v1145_v41, %v1143_v40  ;;  %v422_v43 = vmul.f32 %v1145_v41, %v1141_v39  ;;  %v430_v62 = vmul.f32 %v1145_v41, %v382_v15 }
 0x10b   :  { %v415_v8 = vpop.permute.xlu0 %414 }
 0x10c   :  { %487 = vperm.xlu0 %961, %v426_v42   ;;  %475 = vperm.xlu1 %962, %v422_v43   ;;  %v423_v48 = vmul.f32 %v415_v8, %v1151_v44  ;;  %v427_v53 = vmul.f32 %v415_v8, %v1159_v51  ;;  %v431_v14 = vmul.f32 %v415_v8, %v383_v56 }
 0x10d   :  { %v324_v46 = vpop.permute.xlu1 %323  ;;  %v435_v60 = vmul.f32 %v415_v8, %v1185_v21 }
 0x10e   :  { %v390_v17 = vadd.f32 %v324_v46, %v1109_v6  ;;  %v1188_v6 = vadd.f32 %v335_v38, %v1111_v7  ;;  %v434_v7 = vmul.f32 %v1145_v41, %v386_v26 }
 0x10f   :  { %v343_v27 = vpop.permute.xlu0 %342 }
 0x110   :  { %496 = vperm.xlu0 %961, %v429_v47   ;;  %478 = vperm.xlu1 %962, %v423_v48   ;;  %v438_v2 = vmul.f32 %v1145_v41, %v390_v17  ;;  %v394_v31 = vadd.f32 %v343_v27, %v1117_v11 }
 0x111   :  { %v339_v52 = vpop.permute.xlu1 %338 }
 0x112   :  { %v393_v4 = vadd.f32 %v339_v52, %v1113_v9  ;;  %v442_v28 = vmul.f32 %v1145_v41, %v394_v31 }
 0x114   :  { %490 = vperm.xlu0 %961, %v427_v53   ;;  %481 = vperm.xlu1 %962, %v424_v54   ;;  %v441_v32 = vmul.f32 %v1125_v25, %v393_v4 }
 0x115   :  { %v328_v58 = vpop.permute.xlu1 %327 }
 0x116   :  { %v1173_v57 = vadd.f32 %v328_v58, %v1115_v10  ;;  %v385_v10 = vadd.f32 %v1121_v22, %v1099_v61  ;;  %v440_v61 = vmul.f32 %v1133_v30, %v1188_v6 }
 0x118   :  { %502 = vperm.xlu0 %961, %v431_v14   ;;  %493 = vperm.xlu1 %962, %v428_v50   ;;  %v439_v59 = vmul.f32 %v415_v8, %v1173_v57  ;;  %v433_v5 = vmul.f32 %v1125_v25, %v385_v10 }
 0x119   :  { %v347_v23 = vpop.permute.xlu1 %346 }
 0x11a   :  { %v1198_v22 = vadd.f32 %v347_v23, %v1119_v12 }
 0x11c   :  { %517 = vperm.xlu0 %961, %v436_v18   ;;  %499 = vperm.xlu1 %962, %v430_v62   ;;  %v443_v63 = vmul.f32 %v415_v8, %v1198_v22 }
 0x120   :  { %520 = vperm.xlu1 %962, %v437_v1   ;;  %526 = vperm.xlu0 %961, %v439_v59  }
 0x124   :  { %523 = vperm.xlu1 %962, %v438_v2   ;;  %505 = vperm.xlu0 %961, %v432_v20  }
 0x128   :  { %508 = vperm.xlu1 %962, %v433_v5   ;;  %514 = vperm.xlu0 %961, %v435_v60  }
 0x12c   :  { %511 = vperm.xlu1 %962, %v434_v7   ;;  %529 = vperm.xlu0 %961, %v440_v61  }
 0x130   :  { %532 = vperm.xlu1 %962, %v441_v32   ;;  %538 = vperm.xlu0 %961, %v443_v63  }
 0x134   :  { %535 = vperm.xlu1 %962, %v442_v28   ;;  %735 = vperm.xlu0 %961, %v1131_v29  }
 0x138   :  { %738 = vperm.xlu0 %961, %v1123_v24  }
 0x13c   :  { %747 = vperm.xlu0 %961, %v376_v49  }
 0x140   :  { %750 = vperm.xlu0 %961, %v1137_v33  }
 0x144   :  { %741 = vperm.xlu0 %961, %v1141_v39   ;;  %v541_v39 = vand.u32 127, %v63_v0 }
 0x146   :  { %v546_v42 = vadd.s32 4294967288, %v541_v39  ;;  %v553_v43 = vadd.s32 4294967280, %v541_v39  ;;  %v1216_v8 = vsub.s32 %v541_v39, %v1032_v3  ;;  %v560_v47 = vadd.s32 4294967272, %v541_v39 }
 0x148   :  { %753 = vperm.xlu0 %961, %v1143_v40   ;;  %v1219_v46 = vsub.s32 %v546_v42, %v1032_v3  ;;  %v1223_v49 = vsub.s32 %v553_v43, %v1032_v3 }
 0x14c   :  { %759 = vperm.xlu0 %961, %v380_v55   ;;  %v1228_v55 = vsub.s32 %v560_v47, %v1032_v3 }
 0x150   :  { %762 = vperm.xlu0 %961, %v1153_v45  }
 0x154   :  { %744 = vperm.xlu0 %961, %v1151_v44  }
 0x158   :  { %765 = vperm.xlu0 %961, %v382_v15  }
 0x15c   :  { %771 = vperm.xlu0 %961, %v384_v19  }
 0x160   :  { %774 = vperm.xlu0 %961, %v385_v10  }
 0x164   :  { %768 = vperm.xlu0 %961, %v383_v56  }
 0x168   :  { %777 = vperm.xlu0 %961, %v386_v26  }
 0x16c   :  { %786 = vperm.xlu0 %961, %v389_v16  }
 0x170   :  { %789 = vperm.xlu0 %961, %v390_v17  }
 0x174   :  { %798 = vperm.xlu0 %961, %v393_v4  }
 0x178   :  { %801 = vperm.xlu0 %961, %v394_v31  }
 0x179   :  { %v473_v11 = vpop.permute.xlu1 %472 }
 0x17a   :  { %v550_v16 = vrot.slane %v473_v11, %v1219_v46 }
 0x17f   :  { %v470_v9 = vpop.permute.xlu0 %469 }
 0x180   :  { %v545_v18 = vrot.slane %v470_v9, %v1216_v8 }
 0x182   :  { %v552_v4 = vsel %vm551_vm1, %v550_v16, %v545_v18 }
 0x183   :  { %v485_v12 = vpop.permute.xlu0 %484 }
 0x184   :  { %v574_v0 = vrot.slane %v485_v12, %v1219_v46 }
 0x18b   :  { %v488_v24 = vpop.permute.xlu0 %487  ;;  %v476_v25 = vpop.permute.xlu1 %475 }
 0x18c   :  { %v579_v58 = vrot.slane %v488_v24, %v1223_v49  ;;  %v557_v1 = vrot.slane %v476_v25, %v1223_v49 }
 0x18e   :  { %v559_v63 = vsel %vm558_vm2, %v557_v1, %v552_v4 }
 0x18f   :  { %v497_v29 = vpop.permute.xlu0 %496  ;;  %v479_v30 = vpop.permute.xlu1 %478 }
 0x190   :  { %v593_v15 = vrot.slane %v497_v29, %v1219_v46  ;;  %v564_v20 = vrot.slane %v479_v30, %v1228_v55 }
 0x192   :  { %v566_v11 = vsel %vm565_vm3, %v564_v20, %v559_v63 }
 0x193   :  { %v491_v33 = vpop.permute.xlu0 %490  ;;  %v482_v34 = vpop.permute.xlu1 %481 }
 0x194   :  { %v570_v48 = vrot.slane %v482_v34, %v1216_v8  ;;  %v584_v10 = vrot.slane %v491_v33, %v1228_v55 }
 0x196   :  { %v575_v56 = vsel %vm551_vm1, %v574_v0, %v570_v48  ;;  %v954_v0 = vld [vmem:[%s1344_s2 + $0x20] ss:$0 sm:$0xff] }
 0x197   :  { %v503_v35 = vpop.permute.xlu0 %502  ;;  %v494_v36 = vpop.permute.xlu1 %493  ;;  %v580_v17 = vsel %vm558_vm2, %v579_v58, %v575_v56 }
 0x198   :  { %v589_v54 = vrot.slane %v494_v36, %v1216_v8  ;;  %v603_v23 = vrot.slane %v503_v35, %v1228_v55  ;;  %v585_v7 = vsel %vm565_vm3, %v584_v10, %v580_v17 }
 0x199   :  { %v663_v30 = vsel %vm662_vm4, %v585_v7, %v566_v11 }
 0x19a   :  { %v594_v59 = vsel %vm551_vm1, %v593_v15, %v589_v54 }
 0x19b   :  { %v518_v37 = vpop.permute.xlu0 %517  ;;  %v500_v38 = vpop.permute.xlu1 %499 }
 0x19c   :  { %v598_v14 = vrot.slane %v500_v38, %v1223_v49  ;;  %v627_v28 = vrot.slane %v518_v37, %v1216_v8 }
 0x19e   :  { %v599_v5 = vsel %vm558_vm2, %v598_v14, %v594_v59 }
 0x19f   :  { %v1213_v40 = vpop.permute.xlu0 %526  ;;  %v521_v41 = vpop.permute.xlu1 %520  ;;  %v604_v9 = vsel %vm565_vm3, %v603_v23, %v599_v5 }
 0x1a0   :  { %v631_v26 = vrot.slane %v521_v41, %v1219_v46  ;;  %v665_v36 = vsel %vm664_vm5, %v604_v9, %v663_v30  ;;  %v641_v37 = vrot.slane %v1213_v40, %v1228_v55 }
 0x1a2   :  { %v632_v25 = vsel %vm551_vm1, %v631_v26, %v627_v28 }
 0x1a3   :  { %v506_v44 = vpop.permute.xlu0 %505  ;;  %v524_v45 = vpop.permute.xlu1 %523 }
 0x1a4   :  { %v608_v62 = vrot.slane %v506_v44, %v1216_v8  ;;  %v636_v27 = vrot.slane %v524_v45, %v1223_v49 }
 0x1a6   :  { %v637_v33 = vsel %vm558_vm2, %v636_v27, %v632_v25 }
 0x1a7   :  { %v515_v52 = vpop.permute.xlu0 %514  ;;  %v509_v53 = vpop.permute.xlu1 %508  ;;  %v642_v44 = vsel %vm565_vm3, %v641_v37, %v637_v33 }
 0x1a8   :  { %v612_v50 = vrot.slane %v509_v53, %v1219_v46  ;;  %v622_v31 = vrot.slane %v515_v52, %v1228_v55 }
 0x1aa   :  { %v613_v60 = vsel %vm551_vm1, %v612_v50, %v608_v62 }
 0x1ab   :  { %v512_v3 = vpop.permute.xlu1 %511  ;;  %v530_v19 = vpop.permute.xlu0 %529 }
 0x1ac   :  { %v617_v2 = vrot.slane %v512_v3, %v1223_v49  ;;  %v646_v34 = vrot.slane %v530_v19, %v1216_v8 }
 0x1ae   :  { %v618_v61 = vsel %vm558_vm2, %v617_v2, %v613_v60 }
 0x1af   :  { %v533_v32 = vpop.permute.xlu1 %532  ;;  %v623_v12 = vsel %vm565_vm3, %v622_v31, %v618_v61  ;;  %v539_v29 = vpop.permute.xlu0 %538 }
 0x1b0   :  { %v650_v24 = vrot.slane %v533_v32, %v1219_v46  ;;  %v667_v39 = vsel %vm666_vm6, %v623_v12, %v665_v36  ;;  %v660_v41 = vrot.slane %v539_v29, %v1228_v55 }
 0x1b1   :  { %v669_v47 = vsel %vm668_vm7, %v642_v44, %v667_v39 }
 0x1b2   :  { %v651_v42 = vsel %vm551_vm1, %v650_v24, %v646_v34 }
 0x1b3   :  { %v536_v35 = vpop.permute.xlu1 %535  ;;  %v736_v20 = vpop.permute.xlu0 %735 }
 0x1b4   :  { %v655_v38 = vrot.slane %v536_v35, %v1223_v49  ;;  %v809_v36 = vrot.slane %v736_v20, %v1216_v8 }
 0x1b6   :  { %v656_v43 = vsel %vm558_vm2, %v655_v38, %v651_v42 }
 0x1b7   :  { %v661_v45 = vsel %vm565_vm3, %v660_v41, %v656_v43  ;;  %v739_v10 = vpop.permute.xlu0 %738 }
 0x1b8   :  { %v671_v40 = vsel %vm670_vm8, %v661_v45, %v669_v47  ;;  %v813_v30 = vrot.slane %v739_v10, %v1219_v46 }
 0x1b9   :  { %v674_v48 = vsel %vm673_vm9, %v671_v40, 0.0 }
 0x1ba   :  { %675 = vadd.xlane.f32.xlu1 %v674_v48  ;;  %v814_v41 = vsel %vm551_vm1, %v813_v30, %v809_v36  ;;  %v56_v36 = vld [vmem:[%s1344_s2 + $0x18] sm:$0xf] }
 0x1bb   :  { %v748_v5 = vpop.permute.xlu0 %747 }
 0x1bc   :  { %v828_v39 = vrot.slane %v748_v5, %v1216_v8 }
 0x1bf   :  { %v751_v60 = vpop.permute.xlu0 %750 }
 0x1c0   :  { %v832_v33 = vrot.slane %v751_v60, %v1219_v46 }
 0x1c2   :  { %v833_v43 = vsel %vm551_vm1, %v832_v33, %v828_v39 }
 0x1c3   :  { %v742_v23 = vpop.permute.xlu0 %741 }
 0x1c4   :  { %v818_v34 = vrot.slane %v742_v23, %v1223_v49 }
 0x1c6   :  { %v819_v44 = vsel %vm558_vm2, %v818_v34, %v814_v41 }
 0x1c7   :  { %v754_v26 = vpop.permute.xlu0 %753 }
 0x1c8   :  { %v837_v37 = vrot.slane %v754_v26, %v1223_v49 }
 0x1ca   :  { %v838_v40 = vsel %vm558_vm2, %v837_v37, %v833_v43 }
 0x1cb   :  { %756 = vperm.xlu1 %962, %v1159_v51   ;;  %v760_v61 = vpop.permute.xlu0 %759 }
 0x1cc   :  { %v847_v48 = vrot.slane %v760_v61, %v1216_v8 }
 0x1cf   :  { %783 = vperm.xlu1 %962, %v1165_v13   ;;  %v763_v4 = vpop.permute.xlu0 %762 }
 0x1d3   :  { %780 = vperm.xlu1 %962, %v1185_v21   ;;  %v745_v7 = vpop.permute.xlu0 %744 }
 0x1d4   :  { %v823_v45 = vrot.slane %v745_v7, %v1228_v55 }
 0x1d7   :  { %795 = vperm.xlu1 %962, %v1188_v6   ;;  %v766_v27 = vpop.permute.xlu0 %765 }
 0x1db   :  { %792 = vperm.xlu1 %962, %v1173_v57   ;;  %v772_v31 = vpop.permute.xlu0 %771 }
 0x1df   :  { %804 = vperm.xlu1 %962, %v1198_v22   ;;  %v775_v32 = vpop.permute.xlu0 %774 }
 0x1e3   :  { %v769_v28 = vpop.permute.xlu0 %768 }
 0x1e7   :  { %v778_v11 = vpop.permute.xlu0 %777 }
 0x1eb   :  { %v787_v24 = vpop.permute.xlu0 %786 }
 0x1ef   :  { %v790_v29 = vpop.permute.xlu0 %789 }
 0x1f3   :  { %v799_v38 = vpop.permute.xlu0 %798 }
 0x247   :  { %v676_v52 = vpop.xlane.xlu1 %675 }
 0x248   :  { %v681_v53 = vadd.f32 %v954_v0, %v676_v52  ;;  %v870_v0 = vrot.slane %v775_v32, %v1219_v46 }
 0x24a   :  { %vm682_vm11 = vcmp.gt.f32.partialorder %v681_v53, 0.0  ;;  %v683_v54 = vmul.f32 0.2, %v681_v53 }
 0x24b   :  { %v757_v63 = vpop.permute.xlu1 %756 }
 0x24c   :  { %v684_v51 = vsel %vm682_vm11, %v681_v53, %v683_v54  ;;  %v842_v42 = vrot.slane %v757_v63, %v1228_v55  ;;  %v851_v53 = vrot.slane %v763_v4, %v1219_v46  ;;  %v856_v54 = vrot.slane %v766_v27, %v1223_v49 }
 0x24d   :  { %v686_v56 = vsel %vm685_vm10, %v684_v51, -inf }
 0x24e   :  { %v687_v13 = vrot.slane %v686_v56, 4 }
 0x24f   :  { %v784_v9 = vpop.permute.xlu1 %783 }
 0x250   :  { %v688_v14 = vmax.f32 %v686_v56, %v687_v13  ;;  %v885_v47 = vrot.slane %v784_v9, %v1216_v8  ;;  %v889_v56 = vrot.slane %v787_v24, %v1219_v46 }
 0x252   :  { %v689_v21 = vrot.slane %v688_v14, 2 }
 0x253   :  { %v781_v12 = vpop.permute.xlu1 %780 }
 0x254   :  { %v690_v50 = vmax.f32 %v688_v14, %v689_v21  ;;  %v866_v14 = vrot.slane %v772_v31, %v1216_v8  ;;  %v908_v21 = vrot.slane %v799_v38, %v1219_v46 }
 0x256   :  { %v691_v6 = vrot.slane %v690_v50, 1 }
 0x257   :  { %v796_v25 = vpop.permute.xlu1 %795 }
 0x258   :  { %v692_v58 = vmax.f32 %v690_v50, %v691_v6  ;;  %v904_v52 = vrot.slane %v796_v25, %v1216_v8  ;;  %v802_v50 = vpop.permute.xlu0 %801  ;;  %v843_v6 = vsel %vm565_vm3, %v842_v42, %v838_v40 }
 0x25a   :  { %v693_v57 = vsub.f32 %v684_v51, %v692_v58  ;;  %v875_v51 = vrot.slane %v778_v11, %v1223_v49  ;;  %v880_v58 = vrot.slane %v781_v12, %v1228_v55  ;;  %v909_v8 = vsel %vm551_vm1, %v908_v21, %v904_v52 }
 0x25b   :  { %v793_v35 = vpop.permute.xlu1 %792 }
 0x25c   :  { %v694_v15 = vmul.f32 1.442695, %v693_v57  ;;  %v824_v57 = vsel %vm565_vm3, %v823_v45, %v819_v44 }
 0x25e   :  { %964 = vpow2.f32 %v694_v15  ;;  %v861_v15 = vrot.slane %v769_v28, %v1228_v55 }
 0x25f   :  { %v805_v13 = vpop.permute.xlu1 %804 }
 0x260   :  { %v918_v46 = vrot.slane %v805_v13, %v1228_v55 }
 0x268   :  { %v965_v22 = vpop.eup %964 }
 0x269   :  { %v696_v16 = vsel %vm685_vm10, %v965_v22, 0.0 }
 0x26a   :  { %v697_v18 = vrot.slane %v696_v16, 4 }
 0x26c   :  { %v698_v62 = vadd.f32 %v697_v18, %v696_v16  ;;  %v899_v16 = vrot.slane %v793_v35, %v1228_v55  ;;  %v871_v18 = vsel %vm551_vm1, %v870_v0, %v866_v14 }
 0x26e   :  { %v699_v3 = vrot.slane %v698_v62, 2 }
 0x270   :  { %v700_v1 = vadd.f32 %v699_v3, %v698_v62  ;;  %v894_v62 = vrot.slane %v790_v29, %v1223_v49  ;;  %v852_v3 = vsel %vm551_vm1, %v851_v53, %v847_v48  ;;  %v55_v29 = vld [vmem:[%s1344_s2 + $0x10] sm:$0xf] }
 0x272   :  { %v701_v17 = vrot.slane %v700_v1, 1 }
 0x274   :  { %v702_v59 = vadd.f32 %v701_v17, %v700_v1  ;;  %v876_v1 = vsel %vm558_vm2, %v875_v51, %v871_v18  ;;  %v913_v17 = vrot.slane %v802_v50, %v1223_v49 }
 0x276   :  { %966 = vrcp.f32 %v702_v59  ;;  %v920_v59 = vsel %vm662_vm4, %v843_v6, %v824_v57  ;;  %v914_v55 = vsel %vm558_vm2, %v913_v17, %v909_v8 }
 0x277   :  { %v919_v60 = vsel %vm565_vm3, %v918_v46, %v914_v55 }
 0x280   :  { %v967_v19 = vpop.eup %966 }
 0x281   :  { %v704_v2 = vmul.f32 %v967_v19, %v965_v22  ;;  %v890_v22 = vsel %vm551_vm1, %v889_v56, %v885_v47  ;;  %v857_v19 = vsel %vm558_vm2, %v856_v54, %v852_v3 }
 0x282   :  { %v895_v20 = vsel %vm558_vm2, %v894_v62, %v890_v22  ;;  %v862_v10 = vsel %vm565_vm3, %v861_v15, %v857_v19 }
 0x283   :  { %707 = vperm.xlu0 %961, %v704_v2   ;;  %v881_v2 = vsel %vm565_vm3, %v880_v58, %v876_v1  ;;  %v900_v5 = vsel %vm565_vm3, %v899_v16, %v895_v20  ;;  %v921_v23 = vsel %vm664_vm5, %v862_v10, %v920_v59 }
 0x284   :  { %v922_v49 = vsel %vm666_vm6, %v881_v2, %v921_v23 }
 0x285   :  { %v923_v26 = vsel %vm668_vm7, %v900_v5, %v922_v49 }
 0x286   :  { %v924_v4 = vsel %vm670_vm8, %v919_v60, %v923_v26 }
 0x302   :  { %v708_v61 = vpop.permute.xlu0 %707 }
 0x303   :  { %v926_v7 = vmul.f32 %v924_v4, %v708_v61 }
 0x305   :  { %v927_v27 = vsel %vm673_vm9, %v926_v7, 0.0 }
 0x306   :  { %v928_v31 = vrot.slane %v927_v27, 4 }
 0x308   :  { %v929_v32 = vadd.f32 %v928_v31, %v927_v27 }
 0x30a   :  { %v930_v63 = vrot.slane %v929_v32, 2 }
 0x30c   :  { %v931_v28 = vadd.f32 %v930_v63, %v929_v32 }
 0x30e   :  { %v932_v9 = vrot.slane %v931_v28, 1 }
 0x310   :  { %v933_v11 = vadd.f32 %v932_v9, %v931_v28 }
 0x312   :  { %v935_v12 = vmin.f32 %v933_v11, 0.0  ;;  %vm934_vm12 = vcmp.gt.f32.partialorder %v933_v11, 0.0 }
 0x314   :  { %v936_v24 = vmul.f32 1.442695, %v935_v12 }
 0x316   :  { %968 = vpow2.f32 %v936_v24 }
 0x320   :  { %v969_v25 = vpop.eup %968 }
 0x321   :  { %v955_v30 = vadd.f32 -1.0, %v969_v25 }
 0x323   :  { %v939_v33 = vsel %vm934_vm12, %v933_v11, %v955_v30 }
 0x324   :  { %v940_v34 = vmul.f32 %v939_v33, %v55_v29 }
 0x326   :  { %v942_v35 = vsel %vm941_vm13, %v940_v34, 0.0 }
 0x327   :  { %943 = vadd.xlane.f32.xlu1 %v942_v35 }
 0x3b4   :  { %v944_v37 = vpop.xlane.xlu1 %943 }
 0x3b5   :  { %v945_v38 = vadd.f32 %v944_v37, %v56_v36 }
 0x3b7   :  { %947 = vst.msk [vmem:[%s1345_s3] sm:$0xf] %vm946_vm14, %v945_v38 }
 0x3b8   :  { %952 = vsyncpa [#allocation3], 1 }

</bundles_post_ra>
